<compile_context>
chip_gen: v5e
topology: v5e:2x2
jax: 0.10.0
libtpu: 0.0.40
codegen_flags: <defaults>
</compile_context>

<pallas_src>
import functools
import math

import jax
import jax.numpy as jnp
from jax import lax
from jax.experimental import pallas as pl
from jax.experimental.pallas import tpu as pltpu


def _round_up(n, m):
    return ((n + m - 1) // m) * m


def _cdiv(a, b):
    return (a + b - 1) // b


def _pad2(a, r, c):
    """Zero-pad a 2-D array up to shape (r, c)."""
    pr, pc = r - a.shape[0], c - a.shape[1]
    if pr == 0 and pc == 0:
        return a
    return jnp.pad(a, ((0, pr), (0, pc)))


def _pick_row_tiling(rows, tm):
    """Row tile that minimizes padding; >=2 tiles when possible (v7x: 2 TCs)."""
    n = max(1, _cdiv(rows, tm))
    if n < 2 and rows > 8:
        n = 2
    tm_eff = _round_up(_cdiv(rows, n), 8)
    return tm_eff, tm_eff * n, n


def _pick_ff_tiling(d_ff, tk):
    """d_ff chunk (multiple of 128) that minimizes padding for ~tk chunks."""
    d_ff_pad = _round_up(d_ff, 128)
    n = max(1, _cdiv(d_ff_pad, tk))
    tk_eff = _round_up(_cdiv(d_ff_pad, n), 128)
    return tk_eff, tk_eff * n, n


def _vmem_limit_bytes():
    """Request ~75% of physical VMEM (generation-aware), with a safe fallback."""
    cap = 64 * 1024 * 1024
    try:
        info = pltpu.get_tpu_info()
        cap = int(getattr(info, "vmem_capacity_bytes", cap)) or cap
    except Exception:
        pass
    return max(32 * 1024 * 1024, (cap * 3) // 4)


def ffn_kernel(x_ref, gamma_ref, beta_ref, w1_ref, b1_ref, w2_ref, b2_ref,
               o_ref, ln_ref, acc_ref, *, d_model):
    """Grid: (row_tiles, ff_chunks).  ff axis is a resident-output reduction."""
    k = pl.program_id(1)

    @pl.when(k == 0)
    def _():
        # --- LayerNorm over the real d_model lanes (eps=1e-6, biased var) ---
        x = x_ref[...].astype(jnp.float32)
        d_pad = x.shape[-1]
        inv_d = 1.0 / d_model
        mean = jnp.sum(x, axis=-1, keepdims=True) * inv_d     # pad lanes are 0
        xc = x - mean
        if d_pad != d_model:
            lane = lax.broadcasted_iota(jnp.int32, (1, d_pad), 1)
            xc = xc * (lane < d_model).astype(jnp.float32)     # zero pad lanes
        var = jnp.sum(xc * xc, axis=-1, keepdims=True) * inv_d
        ln = xc * lax.rsqrt(var + 1e-6)
        ln = ln * gamma_ref[...] + beta_ref[...]               # already f32
        ln_ref[...] = ln.astype(ln_ref.dtype)                  # weight dtype
        # Seed accumulator with residual + output bias (pad lanes stay zero).
        acc_ref[...] = x + b2_ref[...]

    # --- First linear chunk: (tm, d_model) @ (d_model, tk_ff) + b1 ---
    w1 = w1_ref[...]
    h = jnp.dot(ln_ref[...], w1, preferred_element_type=jnp.float32) + b1_ref[...]

    # --- gelu (tanh approximation, constants folded, h*h computed once) ---
    c1 = math.sqrt(2.0 / math.pi)
    c2 = 0.044715 * c1
    h2 = h * h
    h = 0.5 * h * (1.0 + jnp.tanh(h * (c1 + c2 * h2)))

    # dropout_1: identity at inference

    # --- Second linear chunk: (tm, tk_ff) @ (tk_ff, d_model), accumulate ---
    w2 = w2_ref[...]
    acc_ref[...] += jnp.dot(h.astype(w2.dtype), w2,
                            preferred_element_type=jnp.float32)

    # dropout_2: identity at inference

    @pl.when(k == pl.num_programs(1) - 1)
    def _():
        o_ref[...] = acc_ref[...].astype(o_ref.dtype)


def positionwise_ffn(x, gamma, beta, w1, b1, w2, b2, *, tm=256, tk_ff=512,
                     use_bf16_weights=True):
    """x: [rows, d_model] -> [rows, d_model].

    Matmuls run in the weight dtype (bf16 by default) with f32 accumulation;
    LayerNorm, gelu, biases and the residual are applied in f32.
    """
    rows, d_model = x.shape
    d_ff = w1.shape[1]
    f32 = jnp.float32

    if use_bf16_weights:
        w1 = jnp.asarray(w1).astype(jnp.bfloat16)
        w2 = jnp.asarray(w2).astype(jnp.bfloat16)

    d_model_pad = _round_up(d_model, 128)
    tm_eff, rows_pad, n_row = _pick_row_tiling(rows, tm)
    tk_eff, d_ff_pad, n_ff = _pick_ff_tiling(d_ff, tk_ff)

    xp = _pad2(x, rows_pad, d_model_pad)
    gp = _pad2(jnp.asarray(gamma).reshape(1, -1).astype(f32), 1, d_model_pad)
    bp = _pad2(jnp.asarray(beta).reshape(1, -1).astype(f32), 1, d_model_pad)
    w1p = _pad2(jnp.asarray(w1), d_model_pad, d_ff_pad)
    b1p = _pad2(jnp.asarray(b1).reshape(1, -1).astype(f32), 1, d_ff_pad)
    w2p = _pad2(jnp.asarray(w2), d_ff_pad, d_model_pad)
    b2p = _pad2(jnp.asarray(b2).reshape(1, -1).astype(f32), 1, d_model_pad)

    out = pl.pallas_call(
        functools.partial(ffn_kernel, d_model=d_model),
        out_shape=jax.ShapeDtypeStruct((rows_pad, d_model_pad), x.dtype),
        grid=(n_row, n_ff),
        in_specs=[
            pl.BlockSpec((tm_eff, d_model_pad), lambda i, k: (i, 0)),  # x rows
            pl.BlockSpec((1, d_model_pad), lambda i, k: (0, 0)),       # gamma
            pl.BlockSpec((1, d_model_pad), lambda i, k: (0, 0)),       # beta
            pl.BlockSpec((d_model_pad, tk_eff), lambda i, k: (0, k)),  # w1 chunk
            pl.BlockSpec((1, tk_eff), lambda i, k: (0, k)),            # b1 chunk
            pl.BlockSpec((tk_eff, d_model_pad), lambda i, k: (k, 0)),  # w2 chunk
            pl.BlockSpec((1, d_model_pad), lambda i, k: (0, 0)),       # b2
        ],
        out_specs=pl.BlockSpec((tm_eff, d_model_pad), lambda i, k: (i, 0)),
        scratch_shapes=[
            pltpu.VMEM((tm_eff, d_model_pad), w1p.dtype),   # LayerNorm output
            pltpu.VMEM((tm_eff, d_model_pad), jnp.float32), # accumulator
        ],
        compiler_params=pltpu.CompilerParams(
            dimension_semantics=("parallel", "arbitrary"),
            vmem_limit_bytes=_vmem_limit_bytes(),
        ),
    )(xp, gp, bp, w1p, b1p, w2p, b2p)

    return out[:rows, :d_model]


def ffn_reference(x, gamma, beta, w1, b1, w2, b2):
    x32 = x.astype(jnp.float32)
    mean = jnp.mean(x32, axis=-1, keepdims=True)
    var = jnp.mean((x32 - mean) ** 2, axis=-1, keepdims=True)
    ln = (x32 - mean) / jnp.sqrt(var + 1e-6) * gamma + beta
    h = ln @ w1.astype(jnp.float32) + b1
    c = math.sqrt(2.0 / math.pi)
    h = 0.5 * h * (1.0 + jnp.tanh(c * (h + 0.044715 * h ** 3)))
    return (h @ w2.astype(jnp.float32) + b2 + x32).astype(x.dtype)


if __name__ == "__main__":
    batch, seq, d_model, d_ff = 2, 8, 32, 64
    key = jax.random.PRNGKey(0)
    kx, k1, k2, k3, k4 = jax.random.split(key, 5)

    x = jax.random.normal(kx, (batch, seq, d_model), dtype=jnp.float32)

    # Deterministic parameter init (matches nn.Linear / nn.LayerNorm shapes).
    w1 = jax.random.normal(k1, (d_model, d_ff), dtype=jnp.float32) * 0.05
    b1 = jax.random.normal(k2, (1, d_ff), dtype=jnp.float32) * 0.01
    w2 = jax.random.normal(k3, (d_ff, d_model), dtype=jnp.float32) * 0.05
    b2 = jax.random.normal(k4, (1, d_model), dtype=jnp.float32) * 0.01
    gamma = jnp.ones((1, d_model), dtype=jnp.float32)
    beta = jnp.zeros((1, d_model), dtype=jnp.float32)

    x2d = x.reshape(batch * seq, d_model)
    ref = ffn_reference(x2d, gamma, beta, w1, b1, w2, b2).reshape(batch, seq, d_model)

    # f32-weight path: tight tolerance vs f32 reference.
    out_f32 = positionwise_ffn(x2d, gamma, beta, w1, b1, w2, b2,
                               use_bf16_weights=False)
    out_f32 = jax.block_until_ready(out_f32).reshape(batch, seq, d_model)
    assert out_f32.shape == (batch, seq, d_model)
    assert jnp.allclose(out_f32, ref, atol=1e-4, rtol=1e-4), (
        float(jnp.max(jnp.abs(out_f32 - ref))))

    # Default bf16-weight path (MXU-native): loose tolerance vs f32 reference.
    out_bf16 = positionwise_ffn(x2d, gamma, beta, w1, b1, w2, b2)
    out_bf16 = jax.block_until_ready(out_bf16).reshape(batch, seq, d_model)
    assert jnp.allclose(out_bf16, ref, atol=3e-2, rtol=3e-2), (
        float(jnp.max(jnp.abs(out_bf16 - ref))))

    print("KERNEL_OK")
</pallas_src>

<mosaic_0001>
module attributes {stable_mosaic.version = 11 : i64} {
  func.func @ffn_kernel(%arg0: i32, %arg1: i32, %arg2: memref<8x128xf32, #tpu.memory_space<vmem>>, %arg3: memref<1x128xf32, #tpu.memory_space<vmem>>, %arg4: memref<1x128xf32, #tpu.memory_space<vmem>>, %arg5: memref<128x128xf32, #tpu.memory_space<vmem>>, %arg6: memref<1x128xf32, #tpu.memory_space<vmem>>, %arg7: memref<128x128xf32, #tpu.memory_space<vmem>>, %arg8: memref<1x128xf32, #tpu.memory_space<vmem>>, %arg9: memref<8x128xf32, #tpu.memory_space<vmem>>, %arg10: memref<8x128xf32, #tpu.memory_space<vmem>>, %arg11: memref<8x128xf32, #tpu.memory_space<vmem>>) attributes {dimension_semantics = [#tpu.dimension_semantics<parallel>, #tpu.dimension_semantics<arbitrary>], iteration_bounds = array<i64: 2, 1>, scalar_prefetch = 0 : i64, scratch_operands = 2 : i64, tpu.core_type = #tpu.core_type<tc>, window_params = [{transform_indices = @transform_0, window_bounds = array<i64: 8, 128>}, {pipeline_mode = #tpu.pipeline_mode<synchronous>, transform_indices = @transform_1, window_bounds = array<i64: 1, 128>}, {pipeline_mode = #tpu.pipeline_mode<synchronous>, transform_indices = @transform_2, window_bounds = array<i64: 1, 128>}, {transform_indices = @transform_3, window_bounds = array<i64: 128, 128>}, {transform_indices = @transform_4, window_bounds = array<i64: 1, 128>}, {transform_indices = @transform_5, window_bounds = array<i64: 128, 128>}, {pipeline_mode = #tpu.pipeline_mode<synchronous>, transform_indices = @transform_6, window_bounds = array<i64: 1, 128>}, {transform_indices = @transform_7, window_bounds = array<i64: 8, 128>}]} {
    %c0_i32 = arith.constant 0 : i32
    %0 = arith.cmpi eq, %arg1, %c0_i32 : i32
    %1 = arith.extui %0 : i1 to i32
    %c0_i32_0 = arith.constant 0 : i32
    %2 = arith.cmpi ne, %1, %c0_i32_0 : i32
    scf.if %2 {
      %c0_19 = arith.constant 0 : index
      %c0_20 = arith.constant 0 : index
      %29 = vector.load %arg2[%c0_19, %c0_20] : memref<8x128xf32, #tpu.memory_space<vmem>>, vector<8x128xf32>
      %cst_21 = arith.constant dense<0.000000e+00> : vector<8xf32>
      %30 = vector.multi_reduction <add>, %29, %cst_21 [1] : vector<8x128xf32> to vector<8xf32>
      %31 = vector.shape_cast %30 : vector<8xf32> to vector<8x1xf32>
      %cst_22 = arith.constant 3.125000e-02 : f32
      %32 = vector.broadcast %cst_22 : f32 to vector<8x1xf32>
      %33 = arith.mulf %31, %32 : vector<8x1xf32>
      %34 = vector.broadcast %33 : vector<8x1xf32> to vector<8x128xf32>
      %35 = arith.subf %29, %34 : vector<8x128xf32>
      %36 = tpu.iota {dimensions = array<i32: 1>} : vector<1x128xi32>
      %c32_i32 = arith.constant 32 : i32
      %37 = vector.broadcast %c32_i32 : i32 to vector<1x128xi32>
      %38 = arith.cmpi slt, %36, %37 : vector<1x128xi32>
      %39 = arith.extui %38 : vector<1x128xi1> to vector<1x128xi32>
      %40 = arith.sitofp %39 : vector<1x128xi32> to vector<1x128xf32>
      %41 = vector.broadcast %40 : vector<1x128xf32> to vector<8x128xf32>
      %42 = arith.mulf %35, %41 : vector<8x128xf32>
      %43 = arith.mulf %42, %42 : vector<8x128xf32>
      %cst_23 = arith.constant dense<0.000000e+00> : vector<8xf32>
      %44 = vector.multi_reduction <add>, %43, %cst_23 [1] : vector<8x128xf32> to vector<8xf32>
      %45 = vector.shape_cast %44 : vector<8xf32> to vector<8x1xf32>
      %cst_24 = arith.constant 3.125000e-02 : f32
      %46 = vector.broadcast %cst_24 : f32 to vector<8x1xf32>
      %47 = arith.mulf %45, %46 : vector<8x1xf32>
      %cst_25 = arith.constant 9.99999997E-7 : f32
      %48 = vector.broadcast %cst_25 : f32 to vector<8x1xf32>
      %49 = arith.addf %47, %48 : vector<8x1xf32>
      %50 = math.rsqrt %49 : vector<8x1xf32>
      %51 = vector.broadcast %50 : vector<8x1xf32> to vector<8x128xf32>
      %52 = arith.mulf %42, %51 : vector<8x128xf32>
      %c0_26 = arith.constant 0 : index
      %c0_27 = arith.constant 0 : index
      %53 = vector.load %arg3[%c0_26, %c0_27] : memref<1x128xf32, #tpu.memory_space<vmem>>, vector<1x128xf32>
      %54 = vector.broadcast %53 : vector<1x128xf32> to vector<8x128xf32>
      %55 = arith.mulf %52, %54 : vector<8x128xf32>
      %c0_28 = arith.constant 0 : index
      %c0_29 = arith.constant 0 : index
      %56 = vector.load %arg4[%c0_28, %c0_29] : memref<1x128xf32, #tpu.memory_space<vmem>>, vector<1x128xf32>
      %57 = vector.broadcast %56 : vector<1x128xf32> to vector<8x128xf32>
      %58 = arith.addf %55, %57 : vector<8x128xf32>
      %c0_30 = arith.constant 0 : index
      %c0_31 = arith.constant 0 : index
      %59 = vector.load %arg10[%c0_30, %c0_31] : memref<8x128xf32, #tpu.memory_space<vmem>>, vector<8x128xf32>
      tpu.vector_store %arg10[%c0_30, %c0_31], %58 {strides = array<i32>} : memref<8x128xf32, #tpu.memory_space<vmem>>, vector<8x128xf32>,
      %c0_32 = arith.constant 0 : index
      %c0_33 = arith.constant 0 : index
      %60 = vector.load %arg8[%c0_32, %c0_33] : memref<1x128xf32, #tpu.memory_space<vmem>>, vector<1x128xf32>
      %61 = vector.broadcast %60 : vector<1x128xf32> to vector<8x128xf32>
      %62 = arith.addf %29, %61 : vector<8x128xf32>
      %c0_34 = arith.constant 0 : index
      %c0_35 = arith.constant 0 : index
      %63 = vector.load %arg11[%c0_34, %c0_35] : memref<8x128xf32, #tpu.memory_space<vmem>>, vector<8x128xf32>
      tpu.vector_store %arg11[%c0_34, %c0_35], %62 {strides = array<i32>} : memref<8x128xf32, #tpu.memory_space<vmem>>, vector<8x128xf32>,
    } else {
    }
    %c0 = arith.constant 0 : index
    %c0_1 = arith.constant 0 : index
    %3 = vector.load %arg5[%c0, %c0_1] : memref<128x128xf32, #tpu.memory_space<vmem>>, vector<128x128xf32>
    %c0_2 = arith.constant 0 : index
    %c0_3 = arith.constant 0 : index
    %4 = vector.load %arg10[%c0_2, %c0_3] : memref<8x128xf32, #tpu.memory_space<vmem>>, vector<8x128xf32>
    %cst = arith.constant dense<0.000000e+00> : vector<8x128xf32>
    %5 = tpu.matmul %4, %3, %cst {dimension_numbers = #tpu.dot_dimension_numbers<[1], [0], [0], [1], [0, 0, 1, 1], [], []>} : vector<8x128xf32>, vector<128x128xf32>, vector<8x128xf32> -> vector<8x128xf32>
    %c0_4 = arith.constant 0 : index
    %c0_5 = arith.constant 0 : index
    %6 = vector.load %arg6[%c0_4, %c0_5] : memref<1x128xf32, #tpu.memory_space<vmem>>, vector<1x128xf32>
    %7 = vector.broadcast %6 : vector<1x128xf32> to vector<8x128xf32>
    %8 = arith.addf %5, %7 : vector<8x128xf32>
    %9 = arith.mulf %8, %8 : vector<8x128xf32>
    %cst_6 = arith.constant 5.000000e-01 : f32
    %10 = vector.broadcast %cst_6 : f32 to vector<8x128xf32>
    %11 = arith.mulf %10, %8 : vector<8x128xf32>
    %cst_7 = arith.constant 0.0356774069 : f32
    %12 = vector.broadcast %cst_7 : f32 to vector<8x128xf32>
    %13 = arith.mulf %12, %9 : vector<8x128xf32>
    %cst_8 = arith.constant 0.797884583 : f32
    %14 = vector.broadcast %cst_8 : f32 to vector<8x128xf32>
    %15 = arith.addf %14, %13 : vector<8x128xf32>
    %16 = arith.mulf %8, %15 : vector<8x128xf32>
    %17 = math.tanh %16 : vector<8x128xf32>
    %cst_9 = arith.constant 1.000000e+00 : f32
    %18 = vector.broadcast %cst_9 : f32 to vector<8x128xf32>
    %19 = arith.addf %18, %17 : vector<8x128xf32>
    %20 = arith.mulf %11, %19 : vector<8x128xf32>
    %c0_10 = arith.constant 0 : index
    %c0_11 = arith.constant 0 : index
    %21 = vector.load %arg7[%c0_10, %c0_11] : memref<128x128xf32, #tpu.memory_space<vmem>>, vector<128x128xf32>
    %c0_12 = arith.constant 0 : index
    %c0_13 = arith.constant 0 : index
    %22 = vector.load %arg11[%c0_12, %c0_13] : memref<8x128xf32, #tpu.memory_space<vmem>>, vector<8x128xf32>
    %cst_14 = arith.constant dense<0.000000e+00> : vector<8x128xf32>
    %23 = tpu.matmul %20, %21, %cst_14 {dimension_numbers = #tpu.dot_dimension_numbers<[1], [0], [0], [1], [0, 0, 1, 1], [], []>} : vector<8x128xf32>, vector<128x128xf32>, vector<8x128xf32> -> vector<8x128xf32>
    %24 = arith.addf %22, %23 : vector<8x128xf32>
    %c0_15 = arith.constant 0 : index
    %c0_16 = arith.constant 0 : index
    %25 = vector.load %arg11[%c0_15, %c0_16] : memref<8x128xf32, #tpu.memory_space<vmem>>, vector<8x128xf32>
    tpu.vector_store %arg11[%c0_15, %c0_16], %24 {strides = array<i32>} : memref<8x128xf32, #tpu.memory_space<vmem>>, vector<8x128xf32>,
    %c0_i32_17 = arith.constant 0 : i32
    %26 = arith.cmpi eq, %arg1, %c0_i32_17 : i32
    %27 = arith.extui %26 : i1 to i32
    %c0_i32_18 = arith.constant 0 : i32
    %28 = arith.cmpi ne, %27, %c0_i32_18 : i32
    scf.if %28 {
      %c0_19 = arith.constant 0 : index
      %c0_20 = arith.constant 0 : index
      %29 = vector.load %arg11[%c0_19, %c0_20] : memref<8x128xf32, #tpu.memory_space<vmem>>, vector<8x128xf32>
      %c0_21 = arith.constant 0 : index
      %c0_22 = arith.constant 0 : index
      %30 = vector.load %arg9[%c0_21, %c0_22] : memref<8x128xf32, #tpu.memory_space<vmem>>, vector<8x128xf32>
      tpu.vector_store %arg9[%c0_21, %c0_22], %29 {strides = array<i32>} : memref<8x128xf32, #tpu.memory_space<vmem>>, vector<8x128xf32>,
    } else {
    }
    return
  }
  func.func @transform_0(%arg0: i32, %arg1: i32) -> (i32, i32) {
    %c0_i32 = arith.constant 0 : i32
    %c0_i32_0 = arith.constant 0 : i32
    return %arg0, %c0_i32 : i32, i32
  }
  func.func @transform_1(%arg0: i32, %arg1: i32) -> (i32, i32) {
    %c0_i32 = arith.constant 0 : i32
    %c0_i32_0 = arith.constant 0 : i32
    %c0_i32_1 = arith.constant 0 : i32
    return %c0_i32, %c0_i32_0 : i32, i32
  }
  func.func @transform_2(%arg0: i32, %arg1: i32) -> (i32, i32) {
    %c0_i32 = arith.constant 0 : i32
    %c0_i32_0 = arith.constant 0 : i32
    %c0_i32_1 = arith.constant 0 : i32
    return %c0_i32, %c0_i32_0 : i32, i32
  }
  func.func @transform_3(%arg0: i32, %arg1: i32) -> (i32, i32) {
    %c0_i32 = arith.constant 0 : i32
    %c0_i32_0 = arith.constant 0 : i32
    return %c0_i32, %arg1 : i32, i32
  }
  func.func @transform_4(%arg0: i32, %arg1: i32) -> (i32, i32) {
    %c0_i32 = arith.constant 0 : i32
    %c0_i32_0 = arith.constant 0 : i32
    return %c0_i32, %arg1 : i32, i32
  }
  func.func @transform_5(%arg0: i32, %arg1: i32) -> (i32, i32) {
    %c0_i32 = arith.constant 0 : i32
    %c0_i32_0 = arith.constant 0 : i32
    return %arg1, %c0_i32 : i32, i32
  }
  func.func @transform_6(%arg0: i32, %arg1: i32) -> (i32, i32) {
    %c0_i32 = arith.constant 0 : i32
    %c0_i32_0 = arith.constant 0 : i32
    %c0_i32_1 = arith.constant 0 : i32
    return %c0_i32, %c0_i32_0 : i32, i32
  }
  func.func @transform_7(%arg0: i32, %arg1: i32) -> (i32, i32) {
    %c0_i32 = arith.constant 0 : i32
    %c0_i32_0 = arith.constant 0 : i32
    return %arg0, %c0_i32 : i32, i32
  }
}

</mosaic_0001>

<bundles_post_ra>
// kernel: tpu_custom_call.1
= control target key start
LH: loop header
LB: loop body
LE: loop exit
PB: predicated region body
PF: predicated region fallthrough
CT: control target
= control target key end

     0   :  { %s1238_s0 = inlined_call_operand.hbm [shape: f32[16,128], index: 0, kind: input, shape index: {}]   ;;  %s1239_s1 = inlined_call_operand.hbm [shape: f32[1,128], index: 1, kind: input, shape index: {}]   ;;  %s1240_s2 = inlined_call_operand.vmem [shape: f32[1,128], index: 2, kind: input, shape index: {}]   ;;  %s1241_s3 = inlined_call_operand.hbm [shape: f32[128,128], index: 3, kind: input, shape index: {}]   ;;  %s1242_s4 = inlined_call_operand.vmem [shape: f32[1,128], index: 4, kind: input, shape index: {}]   ;;  %s1243_s5 = inlined_call_operand.hbm [shape: f32[128,128], index: 5, kind: input, shape index: {}]   ;;  %s1244_s6 = inlined_call_operand.vmem [shape: f32[1,128], index: 6, kind: input, shape index: {}]   ;;  %s1245_s7 = inlined_call_operand.hbm [shape: f32[16,128], index: 7, kind: output, shape index: {}]  }
   0x1   :  { %1246 = sst [smem:[#allocation17_spill]] %s1239_s1 }
   0x2   :  { %1247 = sst [smem:[#allocation18_spill]] %s1241_s3 }
   0x3   :  { %1248 = sst [smem:[#allocation19_spill]] %s1243_s5 }
   0x4   :  { %12 = vsyncpa [#allocation5], 0 }
   0x5   :  { %14 = vsyncpa [#allocation5 + $0x1], 0 }
   0x6   :  { %15 = vsyncpa [#allocation8], 0 }
   0x7   :  { %16 = vsyncpa [#allocation11], 0 }
   0x8   :  { %17 = vsyncpa [#allocation6], 0 }
   0x9   :  { %19 = vsyncpa [#allocation6 + $0x1], 0  ;;  %s1049_s24 = smov 0   ;;  %s1051_s25 = smov 0  }
   0xa   :  { %s1053_s26 = smov 0   ;;  %s1055_s27 = smov 0  }
   0xb   :  { %s1057_s28 = smov 0   ;;  %s1059_s29 = smov 0  }
   0xc LB: > { %s666_s30 = sadd.s32 4294967295, %s1001_s29   ;;  %s667_s8 = sadd.s32 4294967294, %s1001_s29   ;;  %s1001_s29 = sphi %s1059_s29, %s25_s29   ;;  %s997_s28 = sphi %s1057_s28, %s1264_s28   ;;  %s993_s27 = sphi %s1055_s27, %s1263_s27   ;;  %s989_s26 = sphi %s1053_s26, %s1262_s26   ;;  %s985_s25 = sphi %s1051_s25, %s1261_s25   ;;  %s981_s24 = sphi %s1049_s24, %s1260_s24  }
   0xd   : > { %p57_p0 = scmp.ne.s32.totalorder %s985_s25, %s981_s24  ;;  %p1083_p1 = scmp.eq.s32.totalorder %s666_s30, 0 }
   0xe   : > { %p1087_p2 = scmp.eq.s32.totalorder %s666_s30, 1  ;;  %p228_p3 = scmp.eq.s32.totalorder %s667_s8, 1 }
   0xf   : > { %p1093_p4 = por %p1083_p1, %p57_p0  ;;  %p668_p5 = scmp.ge.s32.totalorder %s1001_s29, 1 }
  0x10   : > { %p1098_p6 = por %p228_p3, %p57_p0  ;;  %p235_p7 = scmp.lt.s32.totalorder %s1001_s29, 3 }
  0x11   : > { %s1253_s1 = sld [smem:[#allocation17_spill]]  ;;  %p673_p9 = scmp.ge.s32.totalorder %s1001_s29, 2 }
  0x12   : > { %p1106_p8 = pnand %p668_p5, %p235_p7  ;;  %s1003_s17 = smov [#allocation7]  }
  0x13   : > { %s249_s18 = sshll.u32 %s1003_s17, 4  ;;  %s1255_s3 = sld [smem:[#allocation18_spill]]  ;;  %s250_s18 = int_to_ptr.vmem [resolvable:$true] %s249_s18 }
  0x14   : > { %p703_p10 = pneg %p1106_p8  ;;  %s1004_s23 = smov [#allocation9]  }
  0x15   : > { %s265_s30 = sshll.u32 %s1004_s23, 4  ;;  %s1005_s8 = smov 128   ;;  %s266_s30 = int_to_ptr.vmem [resolvable:$true] %s265_s30 }
  0x16   : > { %p1118_p11 = pnand %p703_p10, %p1083_p1  ;;  %s1006_s13 = smov 8  }
  0x17   : > { %s247_s15 = sshll.u32 %s1253_s1, 4  ;;  %s1257_s5 = sld [smem:[#allocation19_spill]]  ;;  %s248_s15 = int_to_ptr.hbm [resolvable:$true] %s247_s15 }
  0x18   : > { %706 = dma.hbm_to_vmem [thread:$0]  (!%p1118_p11), %s248_s15, 16, %s250_s18, [#allocation8]  }
  0x19   : > { %s263_s21 = sshll.u32 %s1255_s3, 4  ;;  %s1007_s20 = smov [#allocation10]   ;;  %s264_s21 = int_to_ptr.hbm [resolvable:$true] %s263_s21 }
  0x1a   : > { %709 = dma.hbm_to_vmem [thread:$0]  (!%p1118_p11), %s264_s21, 2048, %s266_s30, [#allocation8], %s1005_s8, %s1005_s8, %s1006_s13  }
  0x1b   : > { %s288_s1 = sshll.u32 %s1007_s20, 4  ;;  %s44_s15 = sadd.s32 1, %s989_s26  ;;  %s289_s1 = int_to_ptr.vmem [resolvable:$true] %s288_s1 }
  0x1c   : > { %s37_s18 = sadd.s32 1, %s997_s28  ;;  %p51_p12 = scmp.ne.s32.totalorder %s989_s26, %s985_s25 }
  0x1d   : > { %s286_s19 = sshll.u32 %s1257_s5, 4  ;;  %p39_p13 = scmp.ge.s32.totalorder %s37_s18, 2  ;;  %s287_s19 = int_to_ptr.hbm [resolvable:$true] %s286_s19 }
  0x1e   : > { %712 = dma.hbm_to_vmem [thread:$0]  (!%p1118_p11), %s287_s19, 2048, %s289_s1, [#allocation11], %s1005_s8, %s1005_s8, %s1006_s13  }
  0x1f   : > { %p52_p0 = scmp.eq.s32.totalorder %s1001_s29, 0  ;;  %p1138_p3 = por %p1087_p2, %p51_p12 }
  0x20   : > { %p724_p5 = scmp.lt.s32.totalorder %s1001_s29, 2  ;;  %s1266_s18 = smov (%p39_p13, %s37_s18), 0 }
  0x21   : > { %p1145_p7 = por %p52_p0, %p51_p12  ;;  %s305_s1 = sand.u32 1, %s989_s26  }
  0x22   : > { %s41_s22 = ssub.s32 %s997_s28, %s1266_s18  ;;  %s674_s30 = sshll.u32 %s305_s1, 3 }
  0x23   : > { %p42_p10 = scmp.eq.s32.totalorder %s41_s22, 0  ;;  %s675_s8 = sshll.u32 %s997_s28, 3 }
  0x24   : > { %s313_s17 = scalar_lea.hbm %s1238_s0, %s675_s8  ;;  %s309_s19 = scalar_lea.vmem [#allocation4], %s674_s30 }
  0x25   : > { %s1154_s10 = scalar_select %p42_p10, %s989_s26, %s44_s15  }
  0x26   : > { %s317_s20 = sshll.u32 %s309_s19, 4  ;;  %s315_s3 = sshll.u32 %s313_s17, 4  ;;  %s318_s20 = int_to_ptr.vmem [resolvable:$true] %s317_s20  ;;  %s316_s3 = int_to_ptr.hbm [resolvable:$true] %s315_s3 }
  0x27   : > { %p714_p2 = pnand %p724_p5, %p1145_p7  ;;  %s306_s5 = scalar_lea.sflag [#allocation5], %s305_s1 }
  0x28   : > { %326 = sbr.rel (%p1106_p8) target bundleno = 597 (0x255), region = 48  ;;  %s1166_s15 = sand.u32 (!%p1106_p8), 1, %s985_s25  }
  0x29   : > { %716 = dma.hbm_to_vmem [thread:$0]  (!%p714_p2), %s316_s3, 128, %s318_s20, %s306_s5  }
  0x2a   : > { %s677_s22 = sshll.u32 (!%p1106_p8), %s1166_s15, 3  ;;  %s329_s30 = scalar_lea.sflag (!%p1106_p8), [#allocation5], %s1166_s15 }
  0x2b   : > { %s332_s8 = scalar_lea.vmem (!%p1106_p8), [#allocation4], %s677_s22 }
  0x2d   : > { %964 = dma.done.wait (%p1093_p4), %s329_s30, 128  }
  0x2e   : > { %966 = vsyncadd (%p1093_p4), %s329_s30, 4294967168 }
  0x2f   : > { %968 = dma.done.wait (%p1083_p1), [#allocation8], 2064  }
  0x30   : > { %970 = vsyncadd (%p1083_p1), [#allocation8], 4294965232 }
  0x31   : > { %972 = dma.done.wait (%p1083_p1), [#allocation11], 2048  }
  0x32   : > { %974 = vsyncadd (%p1083_p1), [#allocation11], 4294965248  ;;  %v1184_v0 = vld [vmem:[%s332_s8] sm:$0xff]  ;;  %v395_v3 = vlaneseq  ;;  %v1008_v7 = vmov 0.0   ;;  %v446_v13 = vld [vmem:[#allocation9 + $0x60] sm:$0xff]  ;;  %s684_s16 = sshll.u32 %s993_s27, 3 }
  0x33   : > { %391 = vadd.xlane.f32.xlu0 %v1184_v0  ;;  %v449_v1 = vld [vmem:[#allocation9 + $0x78] sm:$0xff]  ;;  %v448_v2 = vld [vmem:[#allocation9 + $0x70] sm:$0xff]  ;;  %v447_v12 = vld [vmem:[#allocation9 + $0x68] sm:$0xff]  ;;  %s538_s17 = scalar_lea.hbm %s1245_s7, %s684_s16  ;;  %s381_s19 = scalar_lea.vmem [#allocation12], %s677_s22 }
  0x34   : > { %455 = vmatpush.msra.mxu0 %v449_v1  ;;  %v396_v4 = vand.u32 127, %v395_v3  ;;  %v445_v14 = vld [vmem:[#allocation9 + $0x58] sm:$0xff]  ;;  %v444_v15 = vld [vmem:[#allocation9 + $0x50] sm:$0xff]  ;;  %v443_v16 = vld [vmem:[#allocation9 + $0x48] sm:$0xff]  ;;  %s540_s20 = sshll.u32 %s381_s19, 4  ;;  %s542_s30 = sshll.u32 %s538_s17, 4  ;;  %s541_s20 = int_to_ptr.vmem [resolvable:$true] %s540_s20  ;;  %s543_s30 = int_to_ptr.hbm [resolvable:$true] %s542_s30 }
  0x35   : > { %v442_v17 = vld [vmem:[#allocation9 + $0x40] sm:$0xff]  ;;  %v441_v18 = vld [vmem:[#allocation9 + $0x38] sm:$0xff]  ;;  %v440_v19 = vld [vmem:[#allocation9 + $0x30] sm:$0xff]  ;;  %s528_s27 = scalar_lea.sflag [#allocation6], %s1166_s15  ;;  %s925_s8 = sshra.s32 %s543_s30, 4  ;;  %s926_s8 = int_to_ptr.hbm [resolvable:$true] %s925_s8 }
  0x36   : > { %456 = vmatpush.msra.mxu0 %v448_v2  ;;  %vm397_vm0 = vcmp.lt.s32.totalorder %v396_v4, 32  ;;  %v439_v20 = vld [vmem:[#allocation9 + $0x28] sm:$0xff]  ;;  %v438_v21 = vld [vmem:[#allocation9 + $0x20] sm:$0xff]  ;;  %v437_v22 = vld [vmem:[#allocation9 + $0x18] sm:$0xff]  ;;  %s927_s3 = scalar_lea.hbm %s926_s8, 8  ;;  %s931_s11 = scalar_lea.hbm %s1245_s7, 16 }
  0x37   : > { %v682_v8 = vsel %vm397_vm0, 1.0, %v1008_v7  ;;  %v436_v23 = vld [vmem:[#allocation9 + $0x10] sm:$0xff]  ;;  %v435_v24 = vld [vmem:[#allocation9 + $0x8] sm:$0xff]  ;;  %v434_v25 = vld [vmem:[#allocation9] sm:$0xff]  ;;  %p928_p1 = scmp.ne.s32.totalorder %s926_s8, %s927_s3  ;;  %p932_p11 = scmp.lt.s32.totalorder %s926_s8, %s1245_s7 }
  0x38   : > { %457 = vmatpush.msra.mxu0 %v447_v12  ;;  %v498_v26 = vld [vmem:[#allocation10 + $0x78] sm:$0xff]  ;;  %v497_v27 = vld [vmem:[#allocation10 + $0x70] sm:$0xff]  ;;  %v496_v28 = vld [vmem:[#allocation10 + $0x68] sm:$0xff]  ;;  %p933_p12 = scmp.lt.s32.totalorder %s931_s11, %s927_s3 }
  0x39   : > { %500 = vmatpush.msra.mxu1 %v498_v26  ;;  %v495_v31 = vld [vmem:[#allocation10 + $0x60] sm:$0xff]  ;;  %v494_v33 = vld [vmem:[#allocation10 + $0x58] sm:$0xff]  ;;  %v784_v43 = vld [vmem:[%s1240_s2] ss:$0 sm:$0xff]  ;;  %p929_p4 = pnand %p928_p1, %p1138_p3 }
  0x3a   : > { %458 = vmatpush.msra.mxu0 %v446_v13  ;;  %v783_v40 = vld [vmem:[#allocation7] ss:$0 sm:$0xff]  ;;  %v493_v46 = vld [vmem:[#allocation10 + $0x50] sm:$0xff]  ;;  %v492_v47 = vld [vmem:[#allocation10 + $0x48] sm:$0xff]  ;;  %p934_p13 = por %p933_p12, %p932_p11 }
  0x3b   : > { %501 = vmatpush.msra.mxu1 %v497_v27  ;;  %v491_v48 = vld [vmem:[#allocation10 + $0x40] sm:$0xff]  ;;  %v490_v49 = vld [vmem:[#allocation10 + $0x38] sm:$0xff]  ;;  %v489_v50 = vld [vmem:[#allocation10 + $0x30] sm:$0xff]  ;;  %p930_p8 = pneg %p929_p4 }
  0x3c   : > { %459 = vmatpush.msra.mxu0 %v445_v14  ;;  %v488_v51 = vld [vmem:[#allocation10 + $0x28] sm:$0xff]  ;;  %v487_v52 = vld [vmem:[#allocation10 + $0x20] sm:$0xff]  ;;  %v486_v53 = vld [vmem:[#allocation10 + $0x18] sm:$0xff] }
  0x3d   : > { %502 = vmatpush.msra.mxu1 %v496_v28  ;;  %v485_v54 = vld [vmem:[#allocation10 + $0x10] sm:$0xff]  ;;  %v484_v55 = vld [vmem:[#allocation10 + $0x8] sm:$0xff]  ;;  %v483_v56 = vld [vmem:[#allocation10] sm:$0xff]  ;;  %p935_p0 = pnand %p934_p13, %p930_p8 }
  0x3e   : > { %460 = vmatpush.msra.mxu0 %v444_v15  ;;  %v785_v57 = vld [vmem:[%s1242_s4] ss:$0 sm:$0xff] }
  0x3f   : > { %503 = vmatpush.msra.mxu1 %v495_v31 }
  0x40   : > { %461 = vmatpush.msra.mxu0 %v443_v16 }
  0x41   : > { %504 = vmatpush.msra.mxu1 %v494_v33 }
  0x42   : > { %462 = vmatpush.msra.mxu0 %v442_v17 }
  0x43   : > { %505 = vmatpush.msra.mxu1 %v493_v46 }
  0x44   : > { %463 = vmatpush.msra.mxu0 %v441_v18 }
  0x45   : > { %506 = vmatpush.msra.mxu1 %v492_v47 }
  0x46   : > { %464 = vmatpush.msra.mxu0 %v440_v19 }
  0x47   : > { %507 = vmatpush.msra.mxu1 %v491_v48 }
  0x48   : > { %465 = vmatpush.msra.mxu0 %v439_v20 }
  0x49   : > { %508 = vmatpush.msra.mxu1 %v490_v49 }
  0x4a   : > { %466 = vmatpush.msra.mxu0 %v438_v21 }
  0x4b   : > { %509 = vmatpush.msra.mxu1 %v489_v50 }
  0x4c   : > { %467 = vmatpush.msra.mxu0 %v437_v22 }
  0x4d   : > { %510 = vmatpush.msra.mxu1 %v488_v51 }
  0x4e   : > { %468 = vmatpush.msra.mxu0 %v436_v23 }
  0x4f   : > { %511 = vmatpush.msra.mxu1 %v487_v52 }
  0x50   : > { %469 = vmatpush.msra.mxu0 %v435_v24 }
  0x51   : > { %512 = vmatpush.msra.mxu1 %v486_v53 }
  0x52   : > { %470 = vmatpush.msra.mxu0 %v434_v25 }
  0x53   : > { %513 = vmatpush.msra.mxu1 %v485_v54 }
  0x55   : > { %514 = vmatpush.msra.mxu1 %v484_v55 }
  0x57   : > { %515 = vmatpush.msra.mxu1 %v483_v56 }
  0xa6   : > { %v392_v5 = vpop.xlane.xlu0 %391 }
  0xa7   : > { %v393_v6 = vmul.f32 0.03125, %v392_v5  ;;  %v786_v5 = vld [vmem:[%s1244_s6] ss:$0 sm:$0xff] }
  0xa9   : > { %v394_v9 = vsub.f32 %v1184_v0, %v393_v6  ;;  %v432_v6 = vadd.f32 %v786_v5, %v1184_v0 }
  0xab   : > { %v400_v10 = vmul.f32 %v682_v8, %v394_v9 }
  0xad   : > { %v401_v11 = vmul.f32 %v400_v10, %v400_v10 }
  0xaf   : > { %402 = vadd.xlane.f32.xlu0 %v401_v11 }
 0x122   : > { %v403_v29 = vpop.xlane.xlu0 %402 }
 0x123   : > { %v404_v30 = vmul.f32 0.03125, %v403_v29 }
 0x125   : > { %v405_v32 = vadd.f32 1e-06, %v404_v30 }
 0x127   : > { %787 = vrsqrt.f32 %v405_v32  ;;  %vm412_vm2 = vweird.f32 %v405_v32 }
 0x12d   : > { %v788_v34 = vpop.eup %787 }
 0x12e   : > { %v407_v35 = vmul.f32 %v788_v34, %v405_v32  ;;  %vm413_vm1 = vweird.f32 %v788_v34 }
 0x12f   : > { %vm414_vm3 = vmor %vm412_vm2, %vm413_vm1 }
 0x130   : > { %v408_v36 = vmul.f32 %v788_v34, %v407_v35 }
 0x132   : > { %v409_v37 = vmul.f32 0.5, %v408_v36 }
 0x134   : > { %v410_v38 = vsub.f32 1.5, %v409_v37 }
 0x136   : > { %v411_v39 = vmul.f32 %v788_v34, %v410_v38 }
 0x138   : > { %v415_v41 = vsel %vm414_vm3, %v788_v34, %v411_v39 }
 0x139   : > { %v416_v42 = vmul.f32 %v415_v41, %v400_v10 }
 0x13b   : > { %v421_v44 = vmul.f32 %v783_v40, %v416_v42 }
 0x13d   : > { %v426_v45 = vadd.f32 %v784_v43, %v421_v44 }
 0x13f   : > { %471 = vmatmul.f32.vlgmr.msra.gmra.mxu0 %v426_v45 }
 0x1bc   : > { %v472_v58 = vpop.f32.mrf.mxu0 }
 0x1bd   : > { %v473_v59 = vadd.f32 %v785_v57, %v472_v58 }
 0x1bf   : > { %v475_v60 = vmul.f32 %v473_v59, %v473_v59  ;;  %v476_v2 = vmul.f32 0.5, %v473_v59 }
 0x1c1   : > { %v477_v61 = vmul.f32 0.035677407, %v475_v60 }
 0x1c3   : > { %v478_v62 = vadd.f32 0.7978846, %v477_v61 }
 0x1c5   : > { %v479_v63 = vmul.f32 %v478_v62, %v473_v59 }
 0x1c7   : > { %789 = vtanh.f32 %v479_v63 }
 0x1cd   : > { %v790_v1 = vpop.eup %789 }
 0x1ce   : > { %v481_v3 = vadd.f32 1.0, %v790_v1 }
 0x1d0   : > { %v482_v4 = vmul.f32 %v481_v3, %v476_v2 }
 0x1d2   : > { %516 = vmatmul.f32.vlgmr.msra.gmra.mxu1 %v482_v4 }
 0x24f   : > { %v517_v7 = vpop.f32.mrf.mxu1 }
 0x250   : > { %v520_v8 = vadd.f32 %v517_v7, %v432_v6 }
 0x252   : > { %526 = vst [vmem:[%s381_s19] sm:$0xff] %v520_v8 }
 0x253   : > { %938 = shalt.err (!%p935_p0)
}
 0x254   : > { %701 = dma.vmem_to_hbm [thread:$0]  (%p1138_p3), %s541_s20, 128, %s543_s30, %s528_s27  }
 0x255 PF: > { %s554_s15 = sand.u32 1, %s981_s24   ;;  %p718_p5 = pnand %p673_p9, %p1098_p6 }
 0x256   : > { %s555_s23 = scalar_lea.sflag [#allocation6], %s554_s15 }
 0x257   : > { %p719_p7 = pneg %p718_p5 }
 0x259   : > { %976 = dma.done.wait (%p719_p7), %s555_s23, 128  }
 0x25a   : > { %978 = vsyncadd (%p719_p7), %s555_s23, 4294967168  ;;  %s25_s29 = sadd.s32 1, %s1001_s29   ;;  %s1260_s24 = smov %s985_s25 }
 0x25b   : > { %p22_p10 = scmp.ge.s32.totalorder %s25_s29, 4   ;;  %s1261_s25 = smov %s989_s26 }
 0x25c   : > { %s1262_s26 = smov %s1154_s10  ;;  %s1263_s27 = smov %s997_s28 }
 0x25d   : > { %s1264_s28 = smov %s1266_s18  ;;  %24 = sbr.rel (!%p22_p10) target bundleno = 12 (0xc), region = 118 }
 0x262   :  { %561 = vsyncpa [#allocation5], 1 }
 0x263   :  { %563 = vsyncpa [#allocation5 + $0x1], 1 }
 0x264   :  { %564 = vsyncpa [#allocation8], 1 }
 0x265   :  { %565 = vsyncpa [#allocation11], 1 }
 0x266   :  { %566 = vsyncpa [#allocation6], 1 }
 0x267   :  { %568 = vsyncpa [#allocation6 + $0x1], 1 }

</bundles_post_ra>
